<compile_context>
chip_gen: v6e
topology: v6e:2x2x1
jax: 0.10.0
libtpu: 0.0.40
codegen_flags: <defaults>
</compile_context>

<pallas_src>
import functools

import jax
import jax.numpy as jnp
from jax import lax
from jax.experimental import pallas as pl
from jax.experimental.pallas import tpu as pltpu


# ----------------------------------------------------------------------------- 
# Kernel: per-sample NLL (-log softmax at the label), class-axis online LSE.
# grid = (batch tiles ["parallel"], class tiles ["arbitrary"]).
# -----------------------------------------------------------------------------
def _nll_kernel(logits_ref, labels_ref, nll_ref, m_scr, l_scr, p_scr, *,
                num_classes, tile_c, needs_class_mask):
    cid = pl.program_id(1)

    @pl.when(cid == 0)
    def _():
        m_scr[...] = jnp.full_like(m_scr, -jnp.inf)
        l_scr[...] = jnp.zeros_like(l_scr)
        p_scr[...] = jnp.zeros_like(p_scr)

    x = logits_ref[...]                                   # [tb, tc] native dtype
    labels = labels_ref[...]                              # [tb, 1] int32
    tb = x.shape[0]

    col_ids = cid * tile_c + lax.broadcasted_iota(jnp.int32, (tb, tile_c), 1)
    if needs_class_mask:
        # The last class tile may run past C: neutralize the padded lanes.
        x = jnp.where(col_ids < num_classes,
                      x, jnp.asarray(jnp.finfo(x.dtype).min, x.dtype))

    # Row max and class pick in the NATIVE dtype (half-cost passes for bf16).
    # The pick is exact: at most one non-zero element per row survives.
    m_tile = jnp.max(x, axis=-1, keepdims=True).astype(jnp.float32)    # [tb,1]
    picked = jnp.sum(jnp.where(col_ids == labels, x, jnp.zeros_like(x)),
                     axis=-1, keepdims=True).astype(jnp.float32)       # [tb,1]

    m_prev = m_scr[...]
    m_new = jnp.maximum(m_prev, m_tile)
    # The only full-tile f32 temporary: shifted logits feeding exp.
    shifted = x.astype(jnp.float32) - m_new                            # [tb,tc]
    alpha = jnp.exp(m_prev - m_new)                                    # [tb,1]
    l_scr[...] = alpha * l_scr[...] + jnp.sum(jnp.exp(shifted), axis=-1,
                                              keepdims=True)
    m_scr[...] = m_new
    p_scr[...] += picked

    @pl.when(cid == pl.num_programs(1) - 1)
    def _():
        # NLL = logsumexp(logits) - logits[label]
        nll_ref[...] = (m_scr[...] + jnp.log(l_scr[...])) - p_scr[...]


# -----------------------------------------------------------------------------
# Tiling / VMEM heuristics (per TPU generation).
# -----------------------------------------------------------------------------
def _device_vmem_budget():
    """Returns (logits-block byte budget, vmem_limit_bytes cap)."""
    kind = ""
    try:
        kind = jax.devices()[0].device_kind.lower()
    except Exception:
        pass
    if "v6" in kind:
        return 6 << 20, 96 << 20      # 128 MiB physical VMEM; raise scoped limit
    if "v7" in kind:
        return 3 << 20, 40 << 20      # 64 MiB physical per TensorCore
    return 2 << 20, 24 << 20          # v5e / unknown: 16 MiB scoped default


_MAX_TILE_C = 8192  # classes per class tile before tiling the class axis


def _choose_tiles(B, C, dtype, budget_bytes):
    itemsize = jnp.dtype(dtype).itemsize
    sub = max(8, 32 // itemsize)                  # min sublane multiple per dtype
    tile_c = C if C <= _MAX_TILE_C else _MAX_TILE_C
    rows = max(sub, budget_bytes // max(tile_c * itemsize, 1))
    tile_b = B if rows >= B else max(sub, (rows // sub) * sub)
    return int(tile_b), int(tile_c)


# -----------------------------------------------------------------------------
# Wrapper: CustomPolyLoss.forward
# -----------------------------------------------------------------------------
def custom_poly_loss(logits, labels, boundary_losses, *, lambda_penalty=0.1,
                     enable_boundary_loss=True, acc_norm='sum',
                     tile_b=None, tile_c=None):
    """Returns (total_loss, base_loss, boundary_loss, 0.0), all f32 scalars."""
    B, C = logits.shape
    itemsize = jnp.dtype(logits.dtype).itemsize
    sub = max(8, 32 // itemsize)

    if enable_boundary_loss:
        # guard against Python's True == 1 silently selecting the L1 branch
        if isinstance(acc_norm, bool) or acc_norm not in ('sum', 'max', 1, 2):
            raise ValueError(f'Unknown norm type: {acc_norm}')

    budget, vmem_cap = _device_vmem_budget()
    auto_b, auto_c = _choose_tiles(B, C, logits.dtype, budget)
    tile_b = auto_b if tile_b is None else int(tile_b)
    tile_c = auto_c if tile_c is None else int(tile_c)
    if tile_b != B and tile_b % sub != 0:
        raise ValueError(f'tile_b must equal B or be a multiple of {sub}')
    if tile_c != C and tile_c % 128 != 0:
        raise ValueError('tile_c must equal C or be a multiple of 128')

    labels2d = labels.astype(jnp.int32).reshape(B, 1)
    grid = (pl.cdiv(B, tile_b), pl.cdiv(C, tile_c))
    needs_class_mask = (C % tile_c) != 0

    kernel = functools.partial(_nll_kernel, num_classes=C, tile_c=tile_c,
                               needs_class_mask=needs_class_mask)

    # double-buffered logits block + ~3 full-tile f32/i32 temporaries + slack
    block_bytes = tile_b * tile_c * itemsize
    footprint = 2 * block_bytes + 3 * tile_b * tile_c * 4 + (1 << 20)
    vmem_limit = int(min(vmem_cap, max(16 << 20, int(footprint * 1.25))))

    cost = pl.CostEstimate(flops=6 * B * C, transcendentals=B * C,
                           bytes_accessed=B * C * itemsize + 8 * B)

    nll = pl.pallas_call(
        kernel,
        out_shape=jax.ShapeDtypeStruct((B, 1), jnp.float32),
        grid=grid,
        in_specs=[
            pl.BlockSpec((tile_b, tile_c), lambda i, c: (i, c)),   # logits (native dtype)
            pl.BlockSpec((tile_b, 1), lambda i, c: (i, 0)),        # int32 labels
        ],
        out_specs=pl.BlockSpec((tile_b, 1), lambda i, c: (i, 0)),  # per-sample NLL
        scratch_shapes=[pltpu.VMEM((tile_b, 1), jnp.float32),      # running max m
                        pltpu.VMEM((tile_b, 1), jnp.float32),      # running sum-exp l
                        pltpu.VMEM((tile_b, 1), jnp.float32)],     # picked label logit
        compiler_params=pltpu.CompilerParams(
            dimension_semantics=("parallel", "arbitrary"),
            vmem_limit_bytes=vmem_limit),
        cost_estimate=cost,
    )(logits, labels2d)

    # Scalar epilogue in the wrapper (keeps the batch axis "parallel" on v7x):
    # mean over the GLOBAL batch via a compile-time 1/B multiply.
    base_loss = jnp.sum(nll) * jnp.float32(1.0 / B)

    boundary_loss = jnp.float32(0.0)
    total_loss = base_loss
    if enable_boundary_loss:
        b = boundary_losses.astype(jnp.float32)
        if acc_norm == 'sum':
            boundary_loss = jnp.sum(b)
        elif acc_norm == 'max':
            boundary_loss = jnp.max(b)
        elif acc_norm == 1:
            boundary_loss = jnp.sum(jnp.abs(b))
        else:  # acc_norm == 2
            boundary_loss = jnp.sqrt(jnp.sum(b * b))
        total_loss = base_loss + jnp.float32(lambda_penalty) * boundary_loss

    return total_loss, base_loss, boundary_loss, jnp.float32(0.0)


# -----------------------------------------------------------------------------
# Pure-JAX reference (mirrors nn.CrossEntropyLoss + the module's epilogue).
# -----------------------------------------------------------------------------
def _reference(logits, labels, boundary_losses, lambda_penalty, acc_norm,
               enable_boundary_loss=True):
    logp = jax.nn.log_softmax(logits.astype(jnp.float32), axis=-1)
    base = -jnp.mean(jnp.take_along_axis(logp, labels[:, None], axis=-1))
    if not enable_boundary_loss:
        return base, base, jnp.float32(0.0)
    b = boundary_losses.astype(jnp.float32)
    if acc_norm == 'sum':
        bl = jnp.sum(b)
    elif acc_norm == 'max':
        bl = jnp.max(b)
    else:
        bl = jnp.linalg.norm(b, ord=acc_norm)
    return base + lambda_penalty * bl, base, bl


if __name__ == "__main__":
    key = jax.random.PRNGKey(0)
    k1, k2, k3, k4, k5 = jax.random.split(key, 5)

    lam = 0.1
    n_poly_acts = 6  # simulated PolyActivation.current_boundary_loss scalars
    boundary_losses = jnp.abs(jax.random.normal(k3, (n_poly_acts,), jnp.float32))

    # --- test 1: small f32 case, single tile on both axes, acc_norm='sum' -----
    B, C = 8, 32
    logits = jax.random.normal(k1, (B, C), dtype=jnp.float32)
    labels = jax.random.randint(k2, (B,), 0, C, dtype=jnp.int32)

    out = jax.block_until_ready(custom_poly_loss(
        logits, labels, boundary_losses, lambda_penalty=lam,
        enable_boundary_loss=True, acc_norm='sum'))
    rt, rb, rbl = _reference(logits, labels, boundary_losses, lam, 'sum')
    assert jnp.allclose(out[0], rt, atol=1e-5, rtol=1e-5)
    assert jnp.allclose(out[1], rb, atol=1e-5, rtol=1e-5)
    assert jnp.allclose(out[2], rbl, atol=1e-5, rtol=1e-5)
    assert float(out[3]) == 0.0

    # --- test 2: bf16 logits, multi-tile grid on BOTH axes (partial last batch
    #             tile and masked partial class tile), L2 boundary norm --------
    B2, C2 = 40, 200
    logits2 = jax.random.normal(k4, (B2, C2), jnp.float32).astype(jnp.bfloat16)
    labels2 = jax.random.randint(k5, (B2,), 0, C2, dtype=jnp.int32)

    out2 = jax.block_until_ready(custom_poly_loss(
        logits2, labels2, boundary_losses, lambda_penalty=lam,
        enable_boundary_loss=True, acc_norm=2, tile_b=16, tile_c=128))
    rt2, rb2, rbl2 = _reference(logits2.astype(jnp.float32), labels2,
                                boundary_losses, lam, 2)
    assert jnp.allclose(out2[0], rt2, atol=2e-4, rtol=2e-4)
    assert jnp.allclose(out2[1], rb2, atol=2e-4, rtol=2e-4)
    assert jnp.allclose(out2[2], rbl2, atol=2e-4, rtol=2e-4)
    assert float(out2[3]) == 0.0

    # --- test 3: boundary loss disabled ----------------------------------------
    out3 = jax.block_until_ready(custom_poly_loss(
        logits, labels, boundary_losses, lambda_penalty=lam,
        enable_boundary_loss=False))
    assert jnp.allclose(out3[0], rb, atol=1e-5, rtol=1e-5)
    assert float(out3[2]) == 0.0 and float(out3[3]) == 0.0

    # --- test 4: 'max' boundary norm -------------------------------------------
    out4 = jax.block_until_ready(custom_poly_loss(
        logits, labels, boundary_losses, lambda_penalty=lam,
        enable_boundary_loss=True, acc_norm='max'))
    rt4, _, rbl4 = _reference(logits, labels, boundary_losses, lam, 'max')
    assert jnp.allclose(out4[0], rt4, atol=1e-5, rtol=1e-5)
    assert jnp.allclose(out4[2], rbl4, atol=1e-5, rtol=1e-5)

    print("KERNEL_OK")
</pallas_src>

<mosaic_0001>
module attributes {stable_mosaic.version = 11 : i64} {
  func.func @_nll_kernel(%arg0: i32, %arg1: i32, %arg2: memref<8x32xf32, #tpu.memory_space<vmem>>, %arg3: memref<8x1xi32, #tpu.memory_space<vmem>>, %arg4: memref<8x1xf32, #tpu.memory_space<vmem>>, %arg5: memref<8x1xf32, #tpu.memory_space<vmem>>, %arg6: memref<8x1xf32, #tpu.memory_space<vmem>>, %arg7: memref<8x1xf32, #tpu.memory_space<vmem>>) attributes {dimension_semantics = [#tpu.dimension_semantics<parallel>, #tpu.dimension_semantics<arbitrary>], iteration_bounds = array<i64: 1, 1>, scalar_prefetch = 0 : i64, scratch_operands = 3 : i64, tpu.core_type = #tpu.core_type<tc>, window_params = [{transform_indices = @transform_0, window_bounds = array<i64: 8, 32>}, {transform_indices = @transform_1, window_bounds = array<i64: 8, 1>}, {transform_indices = @transform_2, window_bounds = array<i64: 8, 1>}]} {
    %c0_i32 = arith.constant 0 : i32
    %0 = arith.cmpi eq, %arg1, %c0_i32 : i32
    %1 = arith.extui %0 : i1 to i32
    %c0_i32_0 = arith.constant 0 : i32
    %2 = arith.cmpi ne, %1, %c0_i32_0 : i32
    scf.if %2 {
      %cst_21 = arith.constant 0xFF800000 : f32
      %37 = vector.broadcast %cst_21 : f32 to vector<8x1xf32>
      %c0_22 = arith.constant 0 : index
      %c0_23 = arith.constant 0 : index
      %38 = vector.load %arg5[%c0_22, %c0_23] : memref<8x1xf32, #tpu.memory_space<vmem>>, vector<8x1xf32>
      tpu.vector_store %arg5[%c0_22, %c0_23], %37 {strides = array<i32>} : memref<8x1xf32, #tpu.memory_space<vmem>>, vector<8x1xf32>,
      %cst_24 = arith.constant 0.000000e+00 : f32
      %39 = vector.broadcast %cst_24 : f32 to vector<8x1xf32>
      %c0_25 = arith.constant 0 : index
      %c0_26 = arith.constant 0 : index
      %40 = vector.load %arg6[%c0_25, %c0_26] : memref<8x1xf32, #tpu.memory_space<vmem>>, vector<8x1xf32>
      tpu.vector_store %arg6[%c0_25, %c0_26], %39 {strides = array<i32>} : memref<8x1xf32, #tpu.memory_space<vmem>>, vector<8x1xf32>,
      %cst_27 = arith.constant 0.000000e+00 : f32
      %41 = vector.broadcast %cst_27 : f32 to vector<8x1xf32>
      %c0_28 = arith.constant 0 : index
      %c0_29 = arith.constant 0 : index
      %42 = vector.load %arg7[%c0_28, %c0_29] : memref<8x1xf32, #tpu.memory_space<vmem>>, vector<8x1xf32>
      tpu.vector_store %arg7[%c0_28, %c0_29], %41 {strides = array<i32>} : memref<8x1xf32, #tpu.memory_space<vmem>>, vector<8x1xf32>,
    } else {
    }
    %c0 = arith.constant 0 : index
    %c0_1 = arith.constant 0 : index
    %3 = vector.load %arg2[%c0, %c0_1] : memref<8x32xf32, #tpu.memory_space<vmem>>, vector<8x32xf32>
    %c0_2 = arith.constant 0 : index
    %c0_3 = arith.constant 0 : index
    %4 = vector.load %arg3[%c0_2, %c0_3] : memref<8x1xi32, #tpu.memory_space<vmem>>, vector<8x1xi32>
    %c32_i32 = arith.constant 32 : i32
    %5 = arith.muli %arg1, %c32_i32 : i32
    %6 = tpu.iota {dimensions = array<i32: 1>} : vector<8x32xi32>
    %7 = vector.broadcast %5 : i32 to vector<8x32xi32>
    %8 = arith.addi %7, %6 : vector<8x32xi32>
    %cst = arith.constant dense<0xFF800000> : vector<8xf32>
    %9 = vector.multi_reduction <maximumf>, %3, %cst [1] : vector<8x32xf32> to vector<8xf32>
    %10 = vector.shape_cast %9 : vector<8xf32> to vector<8x1xf32>
    %11 = vector.broadcast %4 : vector<8x1xi32> to vector<8x32xi32>
    %12 = arith.cmpi eq, %8, %11 : vector<8x32xi32>
    %cst_4 = arith.constant 0.000000e+00 : f32
    %13 = vector.broadcast %cst_4 : f32 to vector<8x32xf32>
    %14 = arith.select %12, %3, %13 : vector<8x32xi1>, vector<8x32xf32>
    %cst_5 = arith.constant dense<0.000000e+00> : vector<8xf32>
    %15 = vector.multi_reduction <add>, %14, %cst_5 [1] : vector<8x32xf32> to vector<8xf32>
    %16 = vector.shape_cast %15 : vector<8xf32> to vector<8x1xf32>
    %c0_6 = arith.constant 0 : index
    %c0_7 = arith.constant 0 : index
    %17 = vector.load %arg5[%c0_6, %c0_7] : memref<8x1xf32, #tpu.memory_space<vmem>>, vector<8x1xf32>
    %18 = arith.maximumf %17, %10 : vector<8x1xf32>
    %19 = vector.broadcast %18 : vector<8x1xf32> to vector<8x32xf32>
    %20 = arith.subf %3, %19 : vector<8x32xf32>
    %21 = arith.subf %17, %18 : vector<8x1xf32>
    %22 = math.exp %21 : vector<8x1xf32>
    %c0_8 = arith.constant 0 : index
    %c0_9 = arith.constant 0 : index
    %23 = vector.load %arg6[%c0_8, %c0_9] : memref<8x1xf32, #tpu.memory_space<vmem>>, vector<8x1xf32>
    %24 = arith.mulf %22, %23 : vector<8x1xf32>
    %25 = math.exp %20 : vector<8x32xf32>
    %cst_10 = arith.constant dense<0.000000e+00> : vector<8xf32>
    %26 = vector.multi_reduction <add>, %25, %cst_10 [1] : vector<8x32xf32> to vector<8xf32>
    %27 = vector.shape_cast %26 : vector<8xf32> to vector<8x1xf32>
    %28 = arith.addf %24, %27 : vector<8x1xf32>
    %c0_11 = arith.constant 0 : index
    %c0_12 = arith.constant 0 : index
    %29 = vector.load %arg6[%c0_11, %c0_12] : memref<8x1xf32, #tpu.memory_space<vmem>>, vector<8x1xf32>
    tpu.vector_store %arg6[%c0_11, %c0_12], %28 {strides = array<i32>} : memref<8x1xf32, #tpu.memory_space<vmem>>, vector<8x1xf32>,
    %c0_13 = arith.constant 0 : index
    %c0_14 = arith.constant 0 : index
    %30 = vector.load %arg5[%c0_13, %c0_14] : memref<8x1xf32, #tpu.memory_space<vmem>>, vector<8x1xf32>
    tpu.vector_store %arg5[%c0_13, %c0_14], %18 {strides = array<i32>} : memref<8x1xf32, #tpu.memory_space<vmem>>, vector<8x1xf32>,
    %c0_15 = arith.constant 0 : index
    %c0_16 = arith.constant 0 : index
    %31 = vector.load %arg7[%c0_15, %c0_16] : memref<8x1xf32, #tpu.memory_space<vmem>>, vector<8x1xf32>
    %32 = arith.addf %31, %16 : vector<8x1xf32>
    %c0_17 = arith.constant 0 : index
    %c0_18 = arith.constant 0 : index
    %33 = vector.load %arg7[%c0_17, %c0_18] : memref<8x1xf32, #tpu.memory_space<vmem>>, vector<8x1xf32>
    tpu.vector_store %arg7[%c0_17, %c0_18], %32 {strides = array<i32>} : memref<8x1xf32, #tpu.memory_space<vmem>>, vector<8x1xf32>,
    %c0_i32_19 = arith.constant 0 : i32
    %34 = arith.cmpi eq, %arg1, %c0_i32_19 : i32
    %35 = arith.extui %34 : i1 to i32
    %c0_i32_20 = arith.constant 0 : i32
    %36 = arith.cmpi ne, %35, %c0_i32_20 : i32
    scf.if %36 {
      %c0_21 = arith.constant 0 : index
      %c0_22 = arith.constant 0 : index
      %37 = vector.load %arg5[%c0_21, %c0_22] : memref<8x1xf32, #tpu.memory_space<vmem>>, vector<8x1xf32>
      %c0_23 = arith.constant 0 : index
      %c0_24 = arith.constant 0 : index
      %38 = vector.load %arg6[%c0_23, %c0_24] : memref<8x1xf32, #tpu.memory_space<vmem>>, vector<8x1xf32>
      %39 = math.log %38 : vector<8x1xf32>
      %40 = arith.addf %37, %39 : vector<8x1xf32>
      %c0_25 = arith.constant 0 : index
      %c0_26 = arith.constant 0 : index
      %41 = vector.load %arg7[%c0_25, %c0_26] : memref<8x1xf32, #tpu.memory_space<vmem>>, vector<8x1xf32>
      %42 = arith.subf %40, %41 : vector<8x1xf32>
      %c0_27 = arith.constant 0 : index
      %c0_28 = arith.constant 0 : index
      %43 = vector.load %arg4[%c0_27, %c0_28] : memref<8x1xf32, #tpu.memory_space<vmem>>, vector<8x1xf32>
      tpu.vector_store %arg4[%c0_27, %c0_28], %42 {strides = array<i32>} : memref<8x1xf32, #tpu.memory_space<vmem>>, vector<8x1xf32>,
    } else {
    }
    return
  }
  func.func @transform_0(%arg0: i32, %arg1: i32) -> (i32, i32) {
    %c0_i32 = arith.constant 0 : i32
    return %arg0, %arg1 : i32, i32
  }
  func.func @transform_1(%arg0: i32, %arg1: i32) -> (i32, i32) {
    %c0_i32 = arith.constant 0 : i32
    %c0_i32_0 = arith.constant 0 : i32
    return %arg0, %c0_i32 : i32, i32
  }
  func.func @transform_2(%arg0: i32, %arg1: i32) -> (i32, i32) {
    %c0_i32 = arith.constant 0 : i32
    %c0_i32_0 = arith.constant 0 : i32
    return %arg0, %c0_i32 : i32, i32
  }
}

</mosaic_0001>

<bundles_post_ra>
// kernel: tpu_custom_call.1
= control target key start
LH: loop header
LB: loop body
LE: loop exit
PB: predicated region body
PF: predicated region fallthrough
CT: control target
= control target key end

     0   :  { %vm26_vm0 = vcmask 261120   ;;  %vm15_vm1 = vcmask 7168   ;;  %v89_v1 = vmov -inf   ;;  %v90_v3 = vmov 0   ;;  %s126_s0 = inlined_call_operand.vmem [shape: f32[8,32], index: 0, kind: input, shape index: {}]   ;;  %s127_s1 = inlined_call_operand.vmem [shape: s32[8,1], index: 1, kind: input, shape index: {}]   ;;  %s128_s2 = inlined_call_operand.vmem [shape: f32[8,1], index: 2, kind: output, shape index: {}]  }
   0x1   :  { %v19_v0 = vld [vmem:[%s126_s0] sm:$0xff]  ;;  %16 = vst.msk [vmem:[#allocation2] sm:$0xff] %vm15_vm1, %v89_v1  ;;  %81 = vset.pattern.permute.xlu0 %v90_v3  ;;  %82 = vset.pattern.permute.xlu1 %v90_v3  ;;  %v91_v5 = vmov 0.0   ;;  %v22_v13 = vlaneseq }
   0x2   :  { %v27_v2 = vsel %vm26_vm0, %v19_v0, -inf  ;;  %v20_v4 = vld [vmem:[%s127_s1] sm:$0xff]  ;;  %17 = vst.msk [vmem:[#allocation3] sm:$0xff] %vm15_vm1, %v91_v5  ;;  %18 = vst.msk [vmem:[#allocation4] sm:$0xff] %vm15_vm1, %v91_v5 }
   0x3   :  { %28 = vmax.xlane.f32.xlu0 %v27_v2  ;;  %31 = vperm.xlu1 %82, %v20_v4   ;;  %v23_v14 = vand.u32 127, %v22_v13 }
   0x8   :  { %v38_v6 = vld [vmem:[#allocation2] sm:$0xff] }
   0x9   :  { %v49_v22 = vld [vmem:[#allocation3] sm:$0xff]  ;;  %v60_v26 = vld [vmem:[#allocation4] sm:$0xff] }
  0x7e   :  { %v32_v15 = vpop.permute.xlu1 %31 }
  0x7f   :  { %vm33_vm2 = vcmp.eq.s32.totalorder %v23_v14, %v32_v15 }
  0x80   :  { %v34_v17 = vsel %vm33_vm2, %v19_v0, 0.0 }
  0x81   :  { %v35_v19 = vsel %vm26_vm0, %v34_v17, 0.0 }
  0x8c   :  { %v29_v7 = vpop.xlane.xlu0 %28 }
  0x8d   :  { %v39_v8 = vmax.f32 %v38_v6, %v29_v7 }
  0x8f   :  { %v46_v9 = vsub.f32 %v38_v6, %v39_v8  ;;  %59 = vst.msk [vmem:[#allocation2] sm:$0xff] %vm15_vm1, %v39_v8  ;;  %42 = vperm.xlu0 %81, %v39_v8  }
  0x91   :  { %v47_v20 = vmul.f32 1.442695, %v46_v9 }
  0x96   :  { %v66_v32 = vld [vmem:[#allocation2] sm:$0xff] }
 0x10a   :  { %v43_v10 = vpop.permute.xlu0 %42 }
 0x10b   :  { %v45_v11 = vsub.f32 %v19_v0, %v43_v10 }
 0x10d   :  { %v51_v12 = vmul.f32 1.442695, %v45_v11 }
 0x10f   :  { %83 = vpow2.f32 %v51_v12 }
 0x110   :  { %85 = vpow2.f32 %v47_v20 }
 0x11c   :  { %v84_v16 = vpop.eup %83 }
 0x11d   :  { %v53_v18 = vsel %vm26_vm0, %v84_v16, 0.0  ;;  %v86_v21 = vpop.eup %85 }
 0x11e   :  { %54 = vadd.xlane.f32.xlu1 %v53_v18  ;;  %v50_v23 = vmul.f32 %v86_v21, %v49_v22 }
 0x122   :  { %36 = vadd.xlane.f32.xlu1 %v35_v19 }
 0x1a7   :  { %v55_v24 = vpop.xlane.xlu1 %54 }
 0x1a8   :  { %v56_v25 = vadd.f32 %v55_v24, %v50_v23 }
 0x1aa   :  { %58 = vst.msk [vmem:[#allocation3] sm:$0xff] %vm15_vm1, %v56_v25 }
 0x1ab   :  { %v37_v27 = vpop.xlane.xlu1 %36 }
 0x1ac   :  { %v61_v28 = vadd.f32 %v60_v26, %v37_v27 }
 0x1ae   :  { %62 = vst.msk [vmem:[#allocation4] sm:$0xff] %vm15_vm1, %v61_v28 }
 0x1b1   :  { %v67_v29 = vld [vmem:[#allocation3] sm:$0xff] }
 0x1b2   :  { %87 = vlog2.f32 %v67_v29 }
 0x1b5   :  { %v71_v33 = vld [vmem:[#allocation4] sm:$0xff] }
 0x1bf   :  { %v88_v30 = vpop.eup %87 }
 0x1c0   :  { %v69_v31 = vmul.f32 0.6931472, %v88_v30 }
 0x1c2   :  { %v70_v34 = vadd.f32 %v69_v31, %v66_v32 }
 0x1c4   :  { %v72_v35 = vsub.f32 %v70_v34, %v71_v33 }
 0x1c6   :  { %73 = vst.msk [vmem:[%s128_s2] sm:$0xff] %vm15_vm1, %v72_v35 }

</bundles_post_ra>
